<compile_context>
chip_gen: v5e
topology: v5e:2x2
jax: 0.10.0
libtpu: 0.0.40
codegen_flags: <defaults>
</compile_context>

<pallas_src>
import functools

import jax
import jax.numpy as jnp
from jax import lax
from jax.experimental import pallas as pl
from jax.experimental.pallas import tpu as pltpu


# --------------------------------------------------------------------------
# 1x1 conv as a row-tiled matmul with fused per-channel affine
# --------------------------------------------------------------------------

def _matmul_affine_kernel(x_ref, w_ref, s_ref, b_ref, o_ref):
    """o = (x @ w) * s + b, bf16 MXU operands, f32 accumulate + affine."""
    acc = jnp.dot(x_ref[...], w_ref[...], preferred_element_type=jnp.float32)
    o_ref[...] = (acc * s_ref[...] + b_ref[...]).astype(o_ref.dtype)


def matmul_affine(x, w, scale=None, bias=None, *, out_dtype=jnp.float32,
                  tm_target=1024):
    """1x1-conv-as-matmul.  x, w are expected in bf16; scale/bias in f32.

    Row tiles are simply the largest tile <= tm_target (no forced grid split:
    on single-TC chips extra steps are pure overhead; at production M the grid
    is long anyway and v7x can shard it across its two TensorCores).
    """
    M, K = x.shape
    _, Nout = w.shape
    if scale is None:
        scale = jnp.ones((Nout,), jnp.float32)
    if bias is None:
        bias = jnp.zeros((Nout,), jnp.float32)

    tm = min(tm_target, M)
    grid = (pl.cdiv(M, tm),)

    return pl.pallas_call(
        _matmul_affine_kernel,
        out_shape=jax.ShapeDtypeStruct((M, Nout), out_dtype),
        grid=grid,
        in_specs=[
            pl.BlockSpec((tm, K), lambda i: (i, 0)),
            pl.BlockSpec((K, Nout), lambda i: (0, 0)),
            pl.BlockSpec((1, Nout), lambda i: (0, 0)),
            pl.BlockSpec((1, Nout), lambda i: (0, 0)),
        ],
        out_specs=pl.BlockSpec((tm, Nout), lambda i: (i, 0)),
        compiler_params=pltpu.CompilerParams(
            dimension_semantics=("parallel",)),
    )(x, w, scale.reshape(1, Nout).astype(jnp.float32),
      bias.reshape(1, Nout).astype(jnp.float32))


# --------------------------------------------------------------------------
# Fused depthwise 5x5 conv ('same') + grouped 1x1 conv
# --------------------------------------------------------------------------

def _dw5_group1x1_kernel(x_ref, wdw_ref, wpw_ref, o_ref, xp_ref, *, H, W, C):
    """Depthwise 5x5 ('same', halo built in VMEM) + grouped 1x1 as one kernel.

    The grouped 1x1 (groups = 3*heads, dim->dim each) is realised as one
    block-diagonal (C, C) bf16 matmul on the MXU, so the depthwise intermediate
    never leaves VMEM.
    """
    # Build the zero-padded image in VMEM scratch: no HBM round-trip of a
    # padded copy.  Only the interior write is sublane-misaligned (once per
    # image), instead of paying one misaligned shift per tap.
    xp_ref[...] = jnp.zeros_like(xp_ref)
    xp_ref[2:2 + H, 2:2 + W, :] = x_ref[0].astype(jnp.float32)
    xp = xp_ref[...]                                        # (H+4, W+4, C) f32

    # 25 taps on the VPU in f32.  dx (sublane shift) is hoisted to the outer
    # loop: 5 shifted views total, dy is a cheap leading-dim offset.
    acc = None
    for dx in range(5):
        xs = xp[:, dx:dx + W, :]                            # (H+4, W, C)
        for dy in range(5):
            term = xs[dy:dy + H] * wdw_ref[5 * dy + dx]
            acc = term if acc is None else acc + term

    # Grouped 1x1 as block-diagonal matmul, bf16 operands / f32 accumulate.
    # TODO(synk): at production c3 (~1k) the block-diagonal form wastes ~c3/dim
    # of the MXU MACs and ~4 MiB of VMEM for the weight; replace with a
    # per-group (dim, dim) contraction (heads on a leading/batch axis) and
    # row-stripe the image (halo'd stripes) for v7x VMEM / 2-TC sharding.
    o_ref[0] = jnp.dot(acc.reshape(H * W, C).astype(jnp.bfloat16),
                       wpw_ref[...],
                       preferred_element_type=jnp.float32).astype(o_ref.dtype)


def depthwise5_group1x1(x_nhwc, w_dw, w_pw_blockdiag, *, H, W):
    """x_nhwc: (B, H, W, C) UNPADDED input (bf16). Returns (B, H*W, C) bf16."""
    B = x_nhwc.shape[0]
    C = x_nhwc.shape[-1]
    kern = functools.partial(_dw5_group1x1_kernel, H=H, W=W, C=C)
    return pl.pallas_call(
        kern,
        out_shape=jax.ShapeDtypeStruct((B, H * W, C), jnp.bfloat16),
        grid=(B,),
        in_specs=[
            pl.BlockSpec((1, H, W, C), lambda b: (b, 0, 0, 0)),
            pl.BlockSpec((25, 1, 1, C), lambda b: (0, 0, 0, 0)),
            pl.BlockSpec((C, C), lambda b: (0, 0)),
        ],
        out_specs=pl.BlockSpec((1, H * W, C), lambda b: (b, 0, 0)),
        scratch_shapes=[pltpu.VMEM((H + 4, W + 4, C), jnp.float32)],
        compiler_params=pltpu.CompilerParams(
            dimension_semantics=("parallel",)),
    )(x_nhwc, w_dw, w_pw_blockdiag)


# --------------------------------------------------------------------------
# ReLU linear attention, N-chunked, with proj + folded BN fused in the epilogue
# --------------------------------------------------------------------------

def _kv_accum_kernel(qkv_ref, agg_ref, kv_ref, ksum_ref, *, heads, dim):
    """Pass 1: accumulate per-head kv = relu(k)^T @ v and ksum = sum_n relu(k).

    Grid = (B, N_chunks); the N axis is a reduction ("arbitrary"), the kv/ksum
    output blocks stay resident across it and are initialised at chunk 0.
    """
    nc = pl.program_id(1)

    @pl.when(nc == 0)
    def _init():
        kv_ref[...] = jnp.zeros_like(kv_ref)
        ksum_ref[...] = jnp.zeros_like(ksum_ref)

    # TODO(synk): at production head counts, move heads onto a leading axis /
    # grid axis (head groups with >=128-lane width) instead of Python unrolling
    # 8-lane slices; fine at the small head counts used here.
    for s_idx, src in enumerate((qkv_ref, agg_ref)):
        x = src[0].astype(jnp.float32)                      # (nk, 3*heads*dim)
        for h in range(heads):
            base = 3 * dim * h
            k = jnp.maximum(x[:, base + dim:base + 2 * dim], 0.0)
            v = x[:, base + 2 * dim:base + 3 * dim]
            hi = s_idx * heads + h
            kv_ref[0, hi] += lax.dot_general(               # (dim, dim)
                k, v, (((0,), (0,)), ((), ())),
                preferred_element_type=jnp.float32)
            ksum_ref[0, hi] += jnp.sum(k, axis=0, keepdims=True)   # (1, dim)


def _att_proj_kernel(qkv_ref, agg_ref, kv_ref, ksum_ref, wp_ref, s_ref, b_ref,
                     o_ref, *, heads, dim, eps):
    """Pass 2: per chunk, out = (relu(q) @ kv) / (relu(q) . ksum + eps), all
    heads concatenated lane-dense, then the proj 1x1 + folded BN applied before
    the single HBM store (no (B, N, 2*heads*dim) activation in HBM)."""
    outs = []
    for s_idx, src in enumerate((qkv_ref, agg_ref)):
        x = src[0].astype(jnp.float32)                      # (nk, 3*heads*dim)
        for h in range(heads):
            base = 3 * dim * h
            q = jnp.maximum(x[:, base:base + dim], 0.0)
            hi = s_idx * heads + h
            kv = kv_ref[0, hi]                              # (dim, dim) f32
            ksum = ksum_ref[0, hi]                          # (1, dim)   f32
            num = jnp.dot(q, kv, preferred_element_type=jnp.float32)
            den = jnp.sum(q * ksum, axis=-1, keepdims=True)        # (nk, 1)
            # exact (non-approx) reciprocal: safe even when den ~ 0 (then num ~ 0)
            outs.append(num * pl.reciprocal(den + eps, approx=False))
    att = jnp.concatenate(outs, axis=-1)                    # (nk, 2*heads*dim)
    proj = jnp.dot(att.astype(jnp.bfloat16), wp_ref[...],
                   preferred_element_type=jnp.float32)      # (nk, Cout)
    o_ref[0] = proj * s_ref[...] + b_ref[...]


def litemla_attention_proj(qkv_bnc, agg_bnc, w_proj, scale, bias, *,
                           heads, dim, eps, n_chunk=128):
    """Two pallas_calls: kv/ksum accumulation over N chunks, then output+proj."""
    B, N, c3 = qkv_bnc.shape
    S = 2 * heads
    Cout = w_proj.shape[1]
    nk = min(n_chunk, N)
    if N % nk != 0:
        nk = N   # TODO(synk): pad N or pick a divisor for ragged N chunking
    n_chunks = N // nk

    kv_kern = functools.partial(_kv_accum_kernel, heads=heads, dim=dim)
    kv, ksum = pl.pallas_call(
        kv_kern,
        out_shape=(jax.ShapeDtypeStruct((B, S, dim, dim), jnp.float32),
                   jax.ShapeDtypeStruct((B, S, 1, dim), jnp.float32)),
        grid=(B, n_chunks),
        in_specs=[
            pl.BlockSpec((1, nk, c3), lambda b, n: (b, n, 0)),
            pl.BlockSpec((1, nk, c3), lambda b, n: (b, n, 0)),
        ],
        out_specs=(
            pl.BlockSpec((1, S, dim, dim), lambda b, n: (b, 0, 0, 0)),
            pl.BlockSpec((1, S, 1, dim), lambda b, n: (b, 0, 0, 0)),
        ),
        compiler_params=pltpu.CompilerParams(
            dimension_semantics=("parallel", "arbitrary")),
    )(qkv_bnc, agg_bnc)

    out_kern = functools.partial(_att_proj_kernel, heads=heads, dim=dim, eps=eps)
    return pl.pallas_call(
        out_kern,
        out_shape=jax.ShapeDtypeStruct((B, N, Cout), jnp.float32),
        grid=(B, n_chunks),
        in_specs=[
            pl.BlockSpec((1, nk, c3), lambda b, n: (b, n, 0)),
            pl.BlockSpec((1, nk, c3), lambda b, n: (b, n, 0)),
            pl.BlockSpec((1, S, dim, dim), lambda b, n: (b, 0, 0, 0)),
            pl.BlockSpec((1, S, 1, dim), lambda b, n: (b, 0, 0, 0)),
            pl.BlockSpec((2 * heads * dim, Cout), lambda b, n: (0, 0)),
            pl.BlockSpec((1, Cout), lambda b, n: (0, 0)),
            pl.BlockSpec((1, Cout), lambda b, n: (0, 0)),
        ],
        out_specs=pl.BlockSpec((1, nk, Cout), lambda b, n: (b, n, 0)),
        compiler_params=pltpu.CompilerParams(
            dimension_semantics=("parallel", "parallel")),
    )(qkv_bnc, agg_bnc, kv, ksum, w_proj,
      scale.reshape(1, Cout).astype(jnp.float32),
      bias.reshape(1, Cout).astype(jnp.float32))


# --------------------------------------------------------------------------
# Parameter initialization (deterministic, synthetic)
# --------------------------------------------------------------------------

def init_params(key, in_channels, out_channels, *, dim=8, heads_ratio=1.0,
                scales=(5,)):
    assert scales == (5,), "only the default scales=(5,) is implemented"
    heads = int(in_channels // dim * heads_ratio)
    total_dim = heads * dim
    c3 = 3 * total_dim
    groups = 3 * heads
    k = jax.random.split(key, 6)

    w_qkv = 0.1 * jax.random.normal(k[0], (in_channels, c3), jnp.float32)
    w_dw = 0.1 * jax.random.normal(k[1], (5, 5, c3), jnp.float32)
    # grouped 1x1 conv (groups = 3*heads, per-group (dim -> dim) matmul)
    w_pw_g = 0.1 * jax.random.normal(k[2], (groups, dim, dim), jnp.float32)
    w_pw_blockdiag = jax.scipy.linalg.block_diag(*w_pw_g)       # (c3, c3)
    w_proj = 0.1 * jax.random.normal(
        k[3], (total_dim * (1 + len(scales)), out_channels), jnp.float32)
    # BatchNorm2d parameters (eval mode)
    bn_gamma = jax.random.uniform(k[4], (out_channels,), jnp.float32, 0.5, 1.5)
    bn_beta = 0.1 * jax.random.normal(k[5], (out_channels,), jnp.float32)
    bn_mean = jnp.zeros((out_channels,), jnp.float32)
    bn_var = jnp.ones((out_channels,), jnp.float32)

    return dict(w_qkv=w_qkv, w_dw=w_dw, w_pw_blockdiag=w_pw_blockdiag,
                w_proj=w_proj, bn_gamma=bn_gamma, bn_beta=bn_beta,
                bn_mean=bn_mean, bn_var=bn_var, dim=dim, heads=heads)


# --------------------------------------------------------------------------
# Forward pass (Pallas path)
# --------------------------------------------------------------------------

def litemla_forward(x_nchw, params, *, eps=1e-15, n_chunk=128):
    dim = params["dim"]
    heads = params["heads"]
    B, Cin, H, W = x_nchw.shape
    N = H * W
    c3 = params["w_qkv"].shape[1]                      # 3 * heads * dim

    # channels-last, bf16 activations (halves HBM traffic; matmuls accumulate f32)
    x = jnp.transpose(x_nchw.astype(jnp.bfloat16), (0, 2, 3, 1))   # NHWC bf16
    x2d = x.reshape(B * N, Cin)

    # qkv: 1x1 conv, no norm, no activation  (bf16 MXU, f32 accumulate)
    qkv2d = matmul_affine(x2d, params["w_qkv"].astype(jnp.bfloat16),
                          out_dtype=jnp.bfloat16)                  # (B*N, c3)

    # aggreg (scale=5): depthwise 5x5 + grouped 1x1, fused; halo built in VMEM
    agg = depthwise5_group1x1(
        qkv2d.reshape(B, H, W, c3),
        params["w_dw"].reshape(25, 1, 1, c3).astype(jnp.float32),
        params["w_pw_blockdiag"].astype(jnp.bfloat16),
        H=H, W=W)                                                  # (B, N, c3)

    # proj BatchNorm2d (eval mode, running stats) folded into the proj epilogue
    # TODO(synk): training-mode batch statistics are not implemented.
    s = params["bn_gamma"] / jnp.sqrt(params["bn_var"] + 1e-5)
    b = params["bn_beta"] - params["bn_mean"] * s

    # ReLU linear attention over both scales + fused proj/BN epilogue
    out_bnc = litemla_attention_proj(
        qkv2d.reshape(B, N, c3), agg,
        params["w_proj"].astype(jnp.bfloat16), s, b,
        heads=heads, dim=dim, eps=eps, n_chunk=n_chunk)            # (B, N, Cout)

    Cout = params["w_proj"].shape[1]
    out = out_bnc.reshape(B, H, W, Cout)
    return jnp.transpose(out, (0, 3, 1, 2))                        # NCHW f32


# --------------------------------------------------------------------------
# Pure-JAX reference (mirrors the PyTorch forward, NCHW), for validation
# --------------------------------------------------------------------------

def litemla_reference(x_nchw, params, *, eps=1e-15):
    dim = params["dim"]
    hi = lax.Precision.HIGHEST
    B, Cin, H, W = x_nchw.shape
    c3 = params["w_qkv"].shape[1]

    qkv = jnp.einsum("bchw,cd->bdhw", x_nchw, params["w_qkv"], precision=hi)
    w_dw = jnp.transpose(params["w_dw"], (2, 0, 1))[:, None, :, :]  # (c3,1,5,5)
    dw = lax.conv_general_dilated(
        qkv, w_dw, (1, 1), ((2, 2), (2, 2)),
        dimension_numbers=("NCHW", "OIHW", "NCHW"),
        feature_group_count=c3, precision=hi)
    agg = jnp.einsum("bchw,cd->bdhw", dw, params["w_pw_blockdiag"], precision=hi)
    ms = jnp.concatenate([qkv, agg], axis=1)                      # (B, 2*c3, H, W)

    q3 = ms.reshape(B, -1, 3 * dim, H * W)
    q3 = jnp.swapaxes(q3, -1, -2)
    q, k, v = q3[..., :dim], q3[..., dim:2 * dim], q3[..., 2 * dim:]
    q = jnp.maximum(q, 0.0)
    k = jnp.maximum(k, 0.0)
    vpad = jnp.pad(v, ((0, 0), (0, 0), (0, 0), (0, 1)), constant_values=1.0)
    kv = jnp.einsum("bhnd,bhne->bhde", k, vpad, precision=hi)
    out = jnp.einsum("bhnd,bhde->bhne", q, kv, precision=hi)
    out = out[..., :-1] / (out[..., -1:] + eps)
    out = jnp.swapaxes(out, -1, -2).reshape(B, -1, H, W)

    proj = jnp.einsum("bchw,cd->bdhw", out, params["w_proj"], precision=hi)
    s = params["bn_gamma"] / jnp.sqrt(params["bn_var"] + 1e-5)
    b = params["bn_beta"] - params["bn_mean"] * s
    return proj * s[None, :, None, None] + b[None, :, None, None]


# --------------------------------------------------------------------------

if __name__ == "__main__":
    key = jax.random.PRNGKey(0)
    kx, kp = jax.random.split(key)

    B, Cin, H, W = 2, 16, 16, 16
    Cout = 16

    x = jax.random.normal(kx, (B, Cin, H, W), jnp.float32)
    params = init_params(kp, Cin, Cout, dim=8)

    out = jax.block_until_ready(litemla_forward(x, params))
    assert out.shape == (B, Cout, H, W)
    assert bool(jnp.all(jnp.isfinite(out)))

    ref = litemla_reference(x, params)
    max_err = float(jnp.max(jnp.abs(out - ref)))
    # bf16 MXU operands / bf16 inter-kernel activations => slightly looser bound
    assert max_err < 2e-2, f"max abs err vs reference: {max_err}"

    print("KERNEL_OK")
</pallas_src>

<mosaic_0001>
module attributes {stable_mosaic.version = 11 : i64} {
  func.func @_matmul_affine_kernel(%arg0: i32, %arg1: memref<512x16xbf16, #tpu.memory_space<vmem>>, %arg2: memref<16x48xbf16, #tpu.memory_space<vmem>>, %arg3: memref<1x48xf32, #tpu.memory_space<vmem>>, %arg4: memref<1x48xf32, #tpu.memory_space<vmem>>, %arg5: memref<512x48xbf16, #tpu.memory_space<vmem>>) attributes {dimension_semantics = [#tpu.dimension_semantics<parallel>], iteration_bounds = array<i64: 1>, scalar_prefetch = 0 : i64, scratch_operands = 0 : i64, tpu.core_type = #tpu.core_type<tc>, window_params = [{transform_indices = @transform_0, window_bounds = array<i64: 512, 16>}, {pipeline_mode = #tpu.pipeline_mode<synchronous>, transform_indices = @transform_1, window_bounds = array<i64: 16, 48>}, {pipeline_mode = #tpu.pipeline_mode<synchronous>, transform_indices = @transform_2, window_bounds = array<i64: 1, 48>}, {pipeline_mode = #tpu.pipeline_mode<synchronous>, transform_indices = @transform_3, window_bounds = array<i64: 1, 48>}, {transform_indices = @transform_4, window_bounds = array<i64: 512, 48>}]} {
    %c0 = arith.constant 0 : index
    %c0_0 = arith.constant 0 : index
    %0 = vector.load %arg1[%c0, %c0_0] : memref<512x16xbf16, #tpu.memory_space<vmem>>, vector<512x16xbf16>
    %c0_1 = arith.constant 0 : index
    %c0_2 = arith.constant 0 : index
    %1 = vector.load %arg2[%c0_1, %c0_2] : memref<16x48xbf16, #tpu.memory_space<vmem>>, vector<16x48xbf16>
    %cst = arith.constant dense<0.000000e+00> : vector<512x48xf32>
    %2 = tpu.matmul %0, %1, %cst {dimension_numbers = #tpu.dot_dimension_numbers<[1], [0], [0], [1], [0, 0, 1, 1], [], []>} : vector<512x16xbf16>, vector<16x48xbf16>, vector<512x48xf32> -> vector<512x48xf32>
    %c0_3 = arith.constant 0 : index
    %c0_4 = arith.constant 0 : index
    %3 = vector.load %arg3[%c0_3, %c0_4] : memref<1x48xf32, #tpu.memory_space<vmem>>, vector<1x48xf32>
    %4 = vector.broadcast %3 : vector<1x48xf32> to vector<512x48xf32>
    %5 = arith.mulf %2, %4 : vector<512x48xf32>
    %c0_5 = arith.constant 0 : index
    %c0_6 = arith.constant 0 : index
    %6 = vector.load %arg4[%c0_5, %c0_6] : memref<1x48xf32, #tpu.memory_space<vmem>>, vector<1x48xf32>
    %7 = vector.broadcast %6 : vector<1x48xf32> to vector<512x48xf32>
    %8 = arith.addf %5, %7 : vector<512x48xf32>
    %9 = arith.truncf %8 : vector<512x48xf32> to vector<512x48xbf16>
    %c0_7 = arith.constant 0 : index
    %c0_8 = arith.constant 0 : index
    %10 = vector.load %arg5[%c0_7, %c0_8] : memref<512x48xbf16, #tpu.memory_space<vmem>>, vector<512x48xbf16>
    tpu.vector_store %arg5[%c0_7, %c0_8], %9 {strides = array<i32>} : memref<512x48xbf16, #tpu.memory_space<vmem>>, vector<512x48xbf16>,
    return
  }
  func.func @transform_0(%arg0: i32) -> (i32, i32) {
    %c0_i32 = arith.constant 0 : i32
    %c0_i32_0 = arith.constant 0 : i32
    return %arg0, %c0_i32 : i32, i32
  }
  func.func @transform_1(%arg0: i32) -> (i32, i32) {
    %c0_i32 = arith.constant 0 : i32
    %c0_i32_0 = arith.constant 0 : i32
    %c0_i32_1 = arith.constant 0 : i32
    return %c0_i32, %c0_i32_0 : i32, i32
  }
  func.func @transform_2(%arg0: i32) -> (i32, i32) {
    %c0_i32 = arith.constant 0 : i32
    %c0_i32_0 = arith.constant 0 : i32
    %c0_i32_1 = arith.constant 0 : i32
    return %c0_i32, %c0_i32_0 : i32, i32
  }
  func.func @transform_3(%arg0: i32) -> (i32, i32) {
    %c0_i32 = arith.constant 0 : i32
    %c0_i32_0 = arith.constant 0 : i32
    %c0_i32_1 = arith.constant 0 : i32
    return %c0_i32, %c0_i32_0 : i32, i32
  }
  func.func @transform_4(%arg0: i32) -> (i32, i32) {
    %c0_i32 = arith.constant 0 : i32
    %c0_i32_0 = arith.constant 0 : i32
    return %arg0, %c0_i32 : i32, i32
  }
}

</mosaic_0001>

<bundles_post_ra>
// kernel: tpu_custom_call.1
= control target key start
LH: loop header
LB: loop body
LE: loop exit
PB: predicated region body
PF: predicated region fallthrough
CT: control target
= control target key end

     0   :  { %vm250_vm0 = vcmask 130048   ;;  %vm716_vm1 = vcmask 388096   ;;  %s1537_s1 = inlined_call_operand.vmem [shape: bf16[16,48], index: 1, kind: input, shape index: {}]   ;;  %s1538_s0 = inlined_call_operand.vmem [shape: bf16[512,16], index: 0, kind: input, shape index: {}]   ;;  %s1539_s2 = inlined_call_operand.vmem [shape: f32[1,48], index: 2, kind: input, shape index: {}]   ;;  %s1540_s3 = inlined_call_operand.vmem [shape: f32[1,48], index: 3, kind: input, shape index: {}]   ;;  %s1541_s4 = inlined_call_operand.vmem [shape: bf16[512,48], index: 4, kind: output, shape index: {}]  }
   0x1   :  { %v981_v0 = vld [vmem:[%s1537_s1] sm:$0xff]  ;;  %v950_v5 = vld [vmem:[%s1538_s0 + $0x8] sm:$0xff]  ;;  %v951_v9 = vld [vmem:[%s1538_s0 + $0x10] sm:$0xff] }
   0x2   :  { %v949_v1 = vld [vmem:[%s1538_s0] sm:$0xff]  ;;  %354 = vmatpush.bf16.msra.mxu0 %v981_v0  ;;  %982 = vmatpush.bf16.msra.mxu1 %v981_v0  ;;  %v958_v6 = vld [vmem:[%s1538_s0 + $0x48] sm:$0xff]  ;;  %v959_v10 = vld [vmem:[%s1538_s0 + $0x50] sm:$0xff] }
   0x3   :  { %v957_v2 = vld [vmem:[%s1538_s0 + $0x40] sm:$0xff]  ;;  %983 = vmatpush.bf16.msra.mxu2 %v981_v0  ;;  %984 = vmatpush.bf16.msra.mxu3 %v981_v0  ;;  %v966_v7 = vld [vmem:[%s1538_s0 + $0x88] sm:$0xff]  ;;  %v967_v11 = vld [vmem:[%s1538_s0 + $0x90] sm:$0xff] }
   0x4   :  { %v965_v3 = vld [vmem:[%s1538_s0 + $0x80] sm:$0xff]  ;;  %v974_v8 = vld [vmem:[%s1538_s0 + $0xc8] sm:$0xff]  ;;  %v975_v12 = vld [vmem:[%s1538_s0 + $0xd0] sm:$0xff] }
   0x5   :  { %v973_v4 = vld [vmem:[%s1538_s0 + $0xc0] sm:$0xff]  ;;  %917 = vmatmul.msk.bf16.vlgmr.msra.gmra.mxu0 %vm250_vm0, %v949_v1  ;;  %925 = vmatmul.msk.bf16.vlgmr.msra.gmra.mxu1 %vm250_vm0, %v957_v2  ;;  %v952_v13 = vld [vmem:[%s1538_s0 + $0x18] sm:$0xff]  ;;  %v954_v21 = vld [vmem:[%s1538_s0 + $0x28] sm:$0xff] }
   0x6   :  { %933 = vmatmul.msk.bf16.vlgmr.msra.gmra.mxu2 %vm250_vm0, %v965_v3  ;;  %941 = vmatmul.msk.bf16.vlgmr.msra.gmra.mxu3 %vm250_vm0, %v973_v4  ;;  %v960_v14 = vld [vmem:[%s1538_s0 + $0x58] sm:$0xff]  ;;  %v953_v17 = vld [vmem:[%s1538_s0 + $0x20] sm:$0xff]  ;;  %v962_v22 = vld [vmem:[%s1538_s0 + $0x68] sm:$0xff] }
   0x7   :  { %v968_v15 = vld [vmem:[%s1538_s0 + $0x98] sm:$0xff]  ;;  %v961_v18 = vld [vmem:[%s1538_s0 + $0x60] sm:$0xff]  ;;  %v970_v23 = vld [vmem:[%s1538_s0 + $0xa8] sm:$0xff] }
   0x8   :  { %v976_v16 = vld [vmem:[%s1538_s0 + $0xd8] sm:$0xff]  ;;  %v969_v19 = vld [vmem:[%s1538_s0 + $0xa0] sm:$0xff]  ;;  %v978_v24 = vld [vmem:[%s1538_s0 + $0xe8] sm:$0xff] }
   0x9   :  { %v977_v20 = vld [vmem:[%s1538_s0 + $0xe0] sm:$0xff]  ;;  %v955_v25 = vld [vmem:[%s1538_s0 + $0x30] sm:$0xff]  ;;  %v956_v29 = vld [vmem:[%s1538_s0 + $0x38] sm:$0xff] }
   0xa   :  { %v963_v26 = vld [vmem:[%s1538_s0 + $0x70] sm:$0xff]  ;;  %v964_v30 = vld [vmem:[%s1538_s0 + $0x78] sm:$0xff]  ;;  %v1146_v33 = vld [vmem:[%s1539_s2] ss:$0 sm:$0xff] }
   0xb   :  { %v971_v27 = vld [vmem:[%s1538_s0 + $0xb0] sm:$0xff]  ;;  %v972_v31 = vld [vmem:[%s1538_s0 + $0xb8] sm:$0xff]  ;;  %v1151_v34 = vld [vmem:[%s1540_s3] ss:$0 sm:$0xff] }
   0xc   :  { %v979_v28 = vld [vmem:[%s1538_s0 + $0xf0] sm:$0xff]  ;;  %v980_v32 = vld [vmem:[%s1538_s0 + $0xf8] sm:$0xff] }
  0x15   :  { %918 = vmatmul.msk.bf16.gmra.mxu0 %vm250_vm0, %v950_v5  ;;  %926 = vmatmul.msk.bf16.gmra.mxu1 %vm250_vm0, %v958_v6 }
  0x16   :  { %934 = vmatmul.msk.bf16.gmra.mxu2 %vm250_vm0, %v966_v7  ;;  %942 = vmatmul.msk.bf16.gmra.mxu3 %vm250_vm0, %v974_v8 }
  0x25   :  { %919 = vmatmul.msk.bf16.gmra.mxu0 %vm250_vm0, %v951_v9  ;;  %927 = vmatmul.msk.bf16.gmra.mxu1 %vm250_vm0, %v959_v10 }
  0x26   :  { %935 = vmatmul.msk.bf16.gmra.mxu2 %vm250_vm0, %v967_v11  ;;  %943 = vmatmul.msk.bf16.gmra.mxu3 %vm250_vm0, %v975_v12 }
  0x35   :  { %920 = vmatmul.msk.bf16.gmra.mxu0 %vm250_vm0, %v952_v13  ;;  %928 = vmatmul.msk.bf16.gmra.mxu1 %vm250_vm0, %v960_v14 }
  0x36   :  { %936 = vmatmul.msk.bf16.gmra.mxu2 %vm250_vm0, %v968_v15  ;;  %944 = vmatmul.msk.bf16.gmra.mxu3 %vm250_vm0, %v976_v16 }
  0x45   :  { %921 = vmatmul.msk.bf16.gmra.mxu0 %vm250_vm0, %v953_v17  ;;  %929 = vmatmul.msk.bf16.gmra.mxu1 %vm250_vm0, %v961_v18 }
  0x46   :  { %937 = vmatmul.msk.bf16.gmra.mxu2 %vm250_vm0, %v969_v19  ;;  %945 = vmatmul.msk.bf16.gmra.mxu3 %vm250_vm0, %v977_v20 }
  0x55   :  { %922 = vmatmul.msk.bf16.gmra.mxu0 %vm250_vm0, %v954_v21  ;;  %930 = vmatmul.msk.bf16.gmra.mxu1 %vm250_vm0, %v962_v22 }
  0x56   :  { %938 = vmatmul.msk.bf16.gmra.mxu2 %vm250_vm0, %v970_v23  ;;  %946 = vmatmul.msk.bf16.gmra.mxu3 %vm250_vm0, %v978_v24 }
  0x65   :  { %923 = vmatmul.msk.bf16.gmra.mxu0 %vm250_vm0, %v955_v25  ;;  %931 = vmatmul.msk.bf16.gmra.mxu1 %vm250_vm0, %v963_v26 }
  0x66   :  { %939 = vmatmul.msk.bf16.gmra.mxu2 %vm250_vm0, %v971_v27  ;;  %947 = vmatmul.msk.bf16.gmra.mxu3 %vm250_vm0, %v979_v28 }
  0x75   :  { %924 = vmatmul.msk.bf16.gmra.mxu0 %vm250_vm0, %v956_v29  ;;  %932 = vmatmul.msk.bf16.gmra.mxu1 %vm250_vm0, %v964_v30 }
  0x76   :  { %940 = vmatmul.msk.bf16.gmra.mxu2 %vm250_vm0, %v972_v31  ;;  %948 = vmatmul.msk.bf16.gmra.mxu3 %vm250_vm0, %v980_v32 }
  0x82   :  { %v356_v35 = vpop.f32.mrf.mxu0  ;;  %v396_v36 = vpop.f32.mrf.mxu1 }
  0x83   :  { %v520_v37 = vmul.f32 %v1146_v33, %v356_v35  ;;  %v536_v38 = vmul.f32 %v1146_v33, %v396_v36 }
  0x85   :  { %v588_v39 = vadd.f32 %v1151_v34, %v520_v37  ;;  %v604_v40 = vadd.f32 %v1151_v34, %v536_v38 }
  0x87   :  { %v652_v41 = vpack.c.bf16 %v588_v39, %v588_v39  ;;  %v668_v42 = vpack.c.bf16 %v604_v40, %v604_v40 }
  0x89   :  { %717 = vst.msk [vmem:[%s1541_s4] sm:$0xf] %vm716_vm1, %v652_v41  ;;  %v436_v43 = vpop.f32.mrf.mxu2  ;;  %v476_v44 = vpop.f32.mrf.mxu3 }
  0x8a   :  { %733 = vst.msk [vmem:[%s1541_s4 + $0x40] sm:$0xf] %vm716_vm1, %v668_v42  ;;  %v552_v45 = vmul.f32 %v1146_v33, %v436_v43  ;;  %v568_v46 = vmul.f32 %v1146_v33, %v476_v44  ;;  %v358_v47 = vpop.f32.mrf.mxu0  ;;  %v398_v48 = vpop.f32.mrf.mxu1 }
  0x8b   :  { %v521_v49 = vmul.f32 %v1146_v33, %v358_v47  ;;  %v537_v50 = vmul.f32 %v1146_v33, %v398_v48 }
  0x8c   :  { %v620_v51 = vadd.f32 %v1151_v34, %v552_v45  ;;  %v636_v52 = vadd.f32 %v1151_v34, %v568_v46 }
  0x8d   :  { %v589_v53 = vadd.f32 %v1151_v34, %v521_v49  ;;  %v605_v54 = vadd.f32 %v1151_v34, %v537_v50 }
  0x8e   :  { %v684_v55 = vpack.c.bf16 %v620_v51, %v620_v51  ;;  %v700_v56 = vpack.c.bf16 %v636_v52, %v636_v52 }
  0x8f   :  { %v653_v57 = vpack.c.bf16 %v589_v53, %v589_v53  ;;  %v669_v58 = vpack.c.bf16 %v605_v54, %v605_v54 }
  0x90   :  { %749 = vst.msk [vmem:[%s1541_s4 + $0x80] sm:$0xf] %vm716_vm1, %v684_v55 }
  0x91   :  { %765 = vst.msk [vmem:[%s1541_s4 + $0xc0] sm:$0xf] %vm716_vm1, %v700_v56  ;;  %v438_v59 = vpop.f32.mrf.mxu2  ;;  %v478_v60 = vpop.f32.mrf.mxu3 }
  0x92   :  { %718 = vst.msk [vmem:[%s1541_s4 + $0x4] sm:$0xf] %vm716_vm1, %v653_v57  ;;  %v553_v61 = vmul.f32 %v1146_v33, %v438_v59  ;;  %v569_v62 = vmul.f32 %v1146_v33, %v478_v60  ;;  %v361_v63 = vpop.f32.mrf.mxu0  ;;  %v401_v0 = vpop.f32.mrf.mxu1 }
  0x93   :  { %734 = vst.msk [vmem:[%s1541_s4 + $0x44] sm:$0xf] %vm716_vm1, %v669_v58  ;;  %v522_v1 = vmul.f32 %v1146_v33, %v361_v63  ;;  %v538_v2 = vmul.f32 %v1146_v33, %v401_v0 }
  0x94   :  { %v621_v3 = vadd.f32 %v1151_v34, %v553_v61  ;;  %v637_v4 = vadd.f32 %v1151_v34, %v569_v62 }
  0x95   :  { %v590_v5 = vadd.f32 %v1151_v34, %v522_v1  ;;  %v606_v6 = vadd.f32 %v1151_v34, %v538_v2 }
  0x96   :  { %v685_v7 = vpack.c.bf16 %v621_v3, %v621_v3  ;;  %v701_v8 = vpack.c.bf16 %v637_v4, %v637_v4 }
  0x97   :  { %v654_v9 = vpack.c.bf16 %v590_v5, %v590_v5  ;;  %v670_v10 = vpack.c.bf16 %v606_v6, %v606_v6 }
  0x98   :  { %750 = vst.msk [vmem:[%s1541_s4 + $0x84] sm:$0xf] %vm716_vm1, %v685_v7 }
  0x99   :  { %766 = vst.msk [vmem:[%s1541_s4 + $0xc4] sm:$0xf] %vm716_vm1, %v701_v8  ;;  %v441_v11 = vpop.f32.mrf.mxu2  ;;  %v481_v12 = vpop.f32.mrf.mxu3 }
  0x9a   :  { %719 = vst.msk [vmem:[%s1541_s4 + $0x8] sm:$0xf] %vm716_vm1, %v654_v9  ;;  %v554_v13 = vmul.f32 %v1146_v33, %v441_v11  ;;  %v570_v14 = vmul.f32 %v1146_v33, %v481_v12  ;;  %v363_v15 = vpop.f32.mrf.mxu0  ;;  %v403_v16 = vpop.f32.mrf.mxu1 }
  0x9b   :  { %735 = vst.msk [vmem:[%s1541_s4 + $0x48] sm:$0xf] %vm716_vm1, %v670_v10  ;;  %v523_v17 = vmul.f32 %v1146_v33, %v363_v15  ;;  %v539_v18 = vmul.f32 %v1146_v33, %v403_v16 }
  0x9c   :  { %v622_v19 = vadd.f32 %v1151_v34, %v554_v13  ;;  %v638_v20 = vadd.f32 %v1151_v34, %v570_v14 }
  0x9d   :  { %v591_v21 = vadd.f32 %v1151_v34, %v523_v17  ;;  %v607_v22 = vadd.f32 %v1151_v34, %v539_v18 }
  0x9e   :  { %v686_v23 = vpack.c.bf16 %v622_v19, %v622_v19  ;;  %v702_v24 = vpack.c.bf16 %v638_v20, %v638_v20 }
  0x9f   :  { %v655_v25 = vpack.c.bf16 %v591_v21, %v591_v21  ;;  %v671_v26 = vpack.c.bf16 %v607_v22, %v607_v22 }
  0xa0   :  { %751 = vst.msk [vmem:[%s1541_s4 + $0x88] sm:$0xf] %vm716_vm1, %v686_v23 }
  0xa1   :  { %767 = vst.msk [vmem:[%s1541_s4 + $0xc8] sm:$0xf] %vm716_vm1, %v702_v24  ;;  %v443_v27 = vpop.f32.mrf.mxu2  ;;  %v483_v28 = vpop.f32.mrf.mxu3 }
  0xa2   :  { %720 = vst.msk [vmem:[%s1541_s4 + $0xc] sm:$0xf] %vm716_vm1, %v655_v25  ;;  %v555_v29 = vmul.f32 %v1146_v33, %v443_v27  ;;  %v571_v30 = vmul.f32 %v1146_v33, %v483_v28  ;;  %v366_v31 = vpop.f32.mrf.mxu0  ;;  %v406_v32 = vpop.f32.mrf.mxu1 }
  0xa3   :  { %736 = vst.msk [vmem:[%s1541_s4 + $0x4c] sm:$0xf] %vm716_vm1, %v671_v26  ;;  %v524_v35 = vmul.f32 %v1146_v33, %v366_v31  ;;  %v540_v36 = vmul.f32 %v1146_v33, %v406_v32 }
  0xa4   :  { %v623_v37 = vadd.f32 %v1151_v34, %v555_v29  ;;  %v639_v38 = vadd.f32 %v1151_v34, %v571_v30 }
  0xa5   :  { %v592_v39 = vadd.f32 %v1151_v34, %v524_v35  ;;  %v608_v40 = vadd.f32 %v1151_v34, %v540_v36 }
  0xa6   :  { %v687_v41 = vpack.c.bf16 %v623_v37, %v623_v37  ;;  %v703_v42 = vpack.c.bf16 %v639_v38, %v639_v38 }
  0xa7   :  { %v656_v43 = vpack.c.bf16 %v592_v39, %v592_v39  ;;  %v672_v44 = vpack.c.bf16 %v608_v40, %v608_v40 }
  0xa8   :  { %752 = vst.msk [vmem:[%s1541_s4 + $0x8c] sm:$0xf] %vm716_vm1, %v687_v41 }
  0xa9   :  { %768 = vst.msk [vmem:[%s1541_s4 + $0xcc] sm:$0xf] %vm716_vm1, %v703_v42  ;;  %v446_v45 = vpop.f32.mrf.mxu2  ;;  %v486_v46 = vpop.f32.mrf.mxu3 }
  0xaa   :  { %721 = vst.msk [vmem:[%s1541_s4 + $0x10] sm:$0xf] %vm716_vm1, %v656_v43  ;;  %v556_v47 = vmul.f32 %v1146_v33, %v446_v45  ;;  %v572_v48 = vmul.f32 %v1146_v33, %v486_v46  ;;  %v368_v49 = vpop.f32.mrf.mxu0  ;;  %v408_v50 = vpop.f32.mrf.mxu1 }
  0xab   :  { %737 = vst.msk [vmem:[%s1541_s4 + $0x50] sm:$0xf] %vm716_vm1, %v672_v44  ;;  %v525_v51 = vmul.f32 %v1146_v33, %v368_v49  ;;  %v541_v52 = vmul.f32 %v1146_v33, %v408_v50 }
  0xac   :  { %v624_v53 = vadd.f32 %v1151_v34, %v556_v47  ;;  %v640_v54 = vadd.f32 %v1151_v34, %v572_v48 }
  0xad   :  { %v593_v55 = vadd.f32 %v1151_v34, %v525_v51  ;;  %v609_v56 = vadd.f32 %v1151_v34, %v541_v52 }
  0xae   :  { %v688_v57 = vpack.c.bf16 %v624_v53, %v624_v53  ;;  %v704_v58 = vpack.c.bf16 %v640_v54, %v640_v54 }
  0xaf   :  { %v657_v59 = vpack.c.bf16 %v593_v55, %v593_v55  ;;  %v673_v60 = vpack.c.bf16 %v609_v56, %v609_v56 }
  0xb0   :  { %753 = vst.msk [vmem:[%s1541_s4 + $0x90] sm:$0xf] %vm716_vm1, %v688_v57 }
  0xb1   :  { %769 = vst.msk [vmem:[%s1541_s4 + $0xd0] sm:$0xf] %vm716_vm1, %v704_v58  ;;  %v448_v61 = vpop.f32.mrf.mxu2  ;;  %v488_v62 = vpop.f32.mrf.mxu3 }
  0xb2   :  { %722 = vst.msk [vmem:[%s1541_s4 + $0x14] sm:$0xf] %vm716_vm1, %v657_v59  ;;  %v557_v63 = vmul.f32 %v1146_v33, %v448_v61  ;;  %v573_v0 = vmul.f32 %v1146_v33, %v488_v62  ;;  %v371_v1 = vpop.f32.mrf.mxu0  ;;  %v411_v2 = vpop.f32.mrf.mxu1 }
  0xb3   :  { %738 = vst.msk [vmem:[%s1541_s4 + $0x54] sm:$0xf] %vm716_vm1, %v673_v60  ;;  %v526_v3 = vmul.f32 %v1146_v33, %v371_v1  ;;  %v542_v4 = vmul.f32 %v1146_v33, %v411_v2 }
  0xb4   :  { %v625_v5 = vadd.f32 %v1151_v34, %v557_v63  ;;  %v641_v6 = vadd.f32 %v1151_v34, %v573_v0 }
  0xb5   :  { %v594_v7 = vadd.f32 %v1151_v34, %v526_v3  ;;  %v610_v8 = vadd.f32 %v1151_v34, %v542_v4 }
  0xb6   :  { %v689_v9 = vpack.c.bf16 %v625_v5, %v625_v5  ;;  %v705_v10 = vpack.c.bf16 %v641_v6, %v641_v6 }
  0xb7   :  { %v658_v11 = vpack.c.bf16 %v594_v7, %v594_v7  ;;  %v674_v12 = vpack.c.bf16 %v610_v8, %v610_v8 }
  0xb8   :  { %754 = vst.msk [vmem:[%s1541_s4 + $0x94] sm:$0xf] %vm716_vm1, %v689_v9 }
  0xb9   :  { %770 = vst.msk [vmem:[%s1541_s4 + $0xd4] sm:$0xf] %vm716_vm1, %v705_v10  ;;  %v451_v13 = vpop.f32.mrf.mxu2  ;;  %v491_v14 = vpop.f32.mrf.mxu3 }
  0xba   :  { %723 = vst.msk [vmem:[%s1541_s4 + $0x18] sm:$0xf] %vm716_vm1, %v658_v11  ;;  %v558_v15 = vmul.f32 %v1146_v33, %v451_v13  ;;  %v574_v16 = vmul.f32 %v1146_v33, %v491_v14  ;;  %v373_v17 = vpop.f32.mrf.mxu0  ;;  %v413_v18 = vpop.f32.mrf.mxu1 }
  0xbb   :  { %739 = vst.msk [vmem:[%s1541_s4 + $0x58] sm:$0xf] %vm716_vm1, %v674_v12  ;;  %v527_v19 = vmul.f32 %v1146_v33, %v373_v17  ;;  %v543_v20 = vmul.f32 %v1146_v33, %v413_v18 }
  0xbc   :  { %v626_v21 = vadd.f32 %v1151_v34, %v558_v15  ;;  %v642_v22 = vadd.f32 %v1151_v34, %v574_v16 }
  0xbd   :  { %v595_v23 = vadd.f32 %v1151_v34, %v527_v19  ;;  %v611_v24 = vadd.f32 %v1151_v34, %v543_v20 }
  0xbe   :  { %v690_v25 = vpack.c.bf16 %v626_v21, %v626_v21  ;;  %v706_v26 = vpack.c.bf16 %v642_v22, %v642_v22 }
  0xbf   :  { %v659_v27 = vpack.c.bf16 %v595_v23, %v595_v23  ;;  %v675_v28 = vpack.c.bf16 %v611_v24, %v611_v24 }
  0xc0   :  { %755 = vst.msk [vmem:[%s1541_s4 + $0x98] sm:$0xf] %vm716_vm1, %v690_v25 }
  0xc1   :  { %771 = vst.msk [vmem:[%s1541_s4 + $0xd8] sm:$0xf] %vm716_vm1, %v706_v26  ;;  %v453_v29 = vpop.f32.mrf.mxu2  ;;  %v493_v30 = vpop.f32.mrf.mxu3 }
  0xc2   :  { %724 = vst.msk [vmem:[%s1541_s4 + $0x1c] sm:$0xf] %vm716_vm1, %v659_v27  ;;  %v559_v31 = vmul.f32 %v1146_v33, %v453_v29  ;;  %v575_v32 = vmul.f32 %v1146_v33, %v493_v30  ;;  %v376_v35 = vpop.f32.mrf.mxu0  ;;  %v416_v36 = vpop.f32.mrf.mxu1 }
  0xc3   :  { %740 = vst.msk [vmem:[%s1541_s4 + $0x5c] sm:$0xf] %vm716_vm1, %v675_v28  ;;  %v528_v37 = vmul.f32 %v1146_v33, %v376_v35  ;;  %v544_v38 = vmul.f32 %v1146_v33, %v416_v36 }
  0xc4   :  { %v627_v39 = vadd.f32 %v1151_v34, %v559_v31  ;;  %v643_v40 = vadd.f32 %v1151_v34, %v575_v32 }
  0xc5   :  { %v596_v41 = vadd.f32 %v1151_v34, %v528_v37  ;;  %v612_v42 = vadd.f32 %v1151_v34, %v544_v38 }
  0xc6   :  { %v691_v43 = vpack.c.bf16 %v627_v39, %v627_v39  ;;  %v707_v44 = vpack.c.bf16 %v643_v40, %v643_v40 }
  0xc7   :  { %v660_v45 = vpack.c.bf16 %v596_v41, %v596_v41  ;;  %v676_v46 = vpack.c.bf16 %v612_v42, %v612_v42 }
  0xc8   :  { %756 = vst.msk [vmem:[%s1541_s4 + $0x9c] sm:$0xf] %vm716_vm1, %v691_v43 }
  0xc9   :  { %772 = vst.msk [vmem:[%s1541_s4 + $0xdc] sm:$0xf] %vm716_vm1, %v707_v44  ;;  %v456_v47 = vpop.f32.mrf.mxu2  ;;  %v496_v48 = vpop.f32.mrf.mxu3 }
  0xca   :  { %725 = vst.msk [vmem:[%s1541_s4 + $0x20] sm:$0xf] %vm716_vm1, %v660_v45  ;;  %v560_v49 = vmul.f32 %v1146_v33, %v456_v47  ;;  %v576_v50 = vmul.f32 %v1146_v33, %v496_v48  ;;  %v378_v51 = vpop.f32.mrf.mxu0  ;;  %v418_v52 = vpop.f32.mrf.mxu1 }
  0xcb   :  { %741 = vst.msk [vmem:[%s1541_s4 + $0x60] sm:$0xf] %vm716_vm1, %v676_v46  ;;  %v529_v53 = vmul.f32 %v1146_v33, %v378_v51  ;;  %v545_v54 = vmul.f32 %v1146_v33, %v418_v52 }
  0xcc   :  { %v628_v55 = vadd.f32 %v1151_v34, %v560_v49  ;;  %v644_v56 = vadd.f32 %v1151_v34, %v576_v50 }
  0xcd   :  { %v597_v57 = vadd.f32 %v1151_v34, %v529_v53  ;;  %v613_v58 = vadd.f32 %v1151_v34, %v545_v54 }
  0xce   :  { %v692_v59 = vpack.c.bf16 %v628_v55, %v628_v55  ;;  %v708_v60 = vpack.c.bf16 %v644_v56, %v644_v56 }
  0xcf   :  { %v661_v61 = vpack.c.bf16 %v597_v57, %v597_v57  ;;  %v677_v62 = vpack.c.bf16 %v613_v58, %v613_v58 }
  0xd0   :  { %757 = vst.msk [vmem:[%s1541_s4 + $0xa0] sm:$0xf] %vm716_vm1, %v692_v59 }
  0xd1   :  { %773 = vst.msk [vmem:[%s1541_s4 + $0xe0] sm:$0xf] %vm716_vm1, %v708_v60  ;;  %v458_v63 = vpop.f32.mrf.mxu2  ;;  %v498_v0 = vpop.f32.mrf.mxu3 }
  0xd2   :  { %726 = vst.msk [vmem:[%s1541_s4 + $0x24] sm:$0xf] %vm716_vm1, %v661_v61  ;;  %v561_v1 = vmul.f32 %v1146_v33, %v458_v63  ;;  %v577_v2 = vmul.f32 %v1146_v33, %v498_v0  ;;  %v381_v3 = vpop.f32.mrf.mxu0  ;;  %v421_v4 = vpop.f32.mrf.mxu1 }
  0xd3   :  { %742 = vst.msk [vmem:[%s1541_s4 + $0x64] sm:$0xf] %vm716_vm1, %v677_v62  ;;  %v530_v5 = vmul.f32 %v1146_v33, %v381_v3  ;;  %v546_v6 = vmul.f32 %v1146_v33, %v421_v4 }
  0xd4   :  { %v629_v7 = vadd.f32 %v1151_v34, %v561_v1  ;;  %v645_v8 = vadd.f32 %v1151_v34, %v577_v2 }
  0xd5   :  { %v598_v9 = vadd.f32 %v1151_v34, %v530_v5  ;;  %v614_v10 = vadd.f32 %v1151_v34, %v546_v6 }
  0xd6   :  { %v693_v11 = vpack.c.bf16 %v629_v7, %v629_v7  ;;  %v709_v12 = vpack.c.bf16 %v645_v8, %v645_v8 }
  0xd7   :  { %v662_v13 = vpack.c.bf16 %v598_v9, %v598_v9  ;;  %v678_v14 = vpack.c.bf16 %v614_v10, %v614_v10 }
  0xd8   :  { %758 = vst.msk [vmem:[%s1541_s4 + $0xa4] sm:$0xf] %vm716_vm1, %v693_v11 }
  0xd9   :  { %774 = vst.msk [vmem:[%s1541_s4 + $0xe4] sm:$0xf] %vm716_vm1, %v709_v12  ;;  %v461_v15 = vpop.f32.mrf.mxu2  ;;  %v501_v16 = vpop.f32.mrf.mxu3 }
  0xda   :  { %727 = vst.msk [vmem:[%s1541_s4 + $0x28] sm:$0xf] %vm716_vm1, %v662_v13  ;;  %v562_v17 = vmul.f32 %v1146_v33, %v461_v15  ;;  %v578_v18 = vmul.f32 %v1146_v33, %v501_v16  ;;  %v383_v19 = vpop.f32.mrf.mxu0  ;;  %v423_v20 = vpop.f32.mrf.mxu1 }
  0xdb   :  { %743 = vst.msk [vmem:[%s1541_s4 + $0x68] sm:$0xf] %vm716_vm1, %v678_v14  ;;  %v531_v21 = vmul.f32 %v1146_v33, %v383_v19  ;;  %v547_v22 = vmul.f32 %v1146_v33, %v423_v20 }
  0xdc   :  { %v630_v23 = vadd.f32 %v1151_v34, %v562_v17  ;;  %v646_v24 = vadd.f32 %v1151_v34, %v578_v18 }
  0xdd   :  { %v599_v25 = vadd.f32 %v1151_v34, %v531_v21  ;;  %v615_v26 = vadd.f32 %v1151_v34, %v547_v22 }
  0xde   :  { %v694_v27 = vpack.c.bf16 %v630_v23, %v630_v23  ;;  %v710_v28 = vpack.c.bf16 %v646_v24, %v646_v24 }
  0xdf   :  { %v663_v29 = vpack.c.bf16 %v599_v25, %v599_v25  ;;  %v679_v30 = vpack.c.bf16 %v615_v26, %v615_v26 }
  0xe0   :  { %759 = vst.msk [vmem:[%s1541_s4 + $0xa8] sm:$0xf] %vm716_vm1, %v694_v27 }
  0xe1   :  { %775 = vst.msk [vmem:[%s1541_s4 + $0xe8] sm:$0xf] %vm716_vm1, %v710_v28  ;;  %v463_v31 = vpop.f32.mrf.mxu2  ;;  %v503_v32 = vpop.f32.mrf.mxu3 }
  0xe2   :  { %728 = vst.msk [vmem:[%s1541_s4 + $0x2c] sm:$0xf] %vm716_vm1, %v663_v29  ;;  %v563_v35 = vmul.f32 %v1146_v33, %v463_v31  ;;  %v579_v36 = vmul.f32 %v1146_v33, %v503_v32  ;;  %v386_v37 = vpop.f32.mrf.mxu0  ;;  %v426_v38 = vpop.f32.mrf.mxu1 }
  0xe3   :  { %744 = vst.msk [vmem:[%s1541_s4 + $0x6c] sm:$0xf] %vm716_vm1, %v679_v30  ;;  %v532_v39 = vmul.f32 %v1146_v33, %v386_v37  ;;  %v548_v40 = vmul.f32 %v1146_v33, %v426_v38 }
  0xe4   :  { %v631_v41 = vadd.f32 %v1151_v34, %v563_v35  ;;  %v647_v42 = vadd.f32 %v1151_v34, %v579_v36 }
  0xe5   :  { %v600_v43 = vadd.f32 %v1151_v34, %v532_v39  ;;  %v616_v44 = vadd.f32 %v1151_v34, %v548_v40 }
  0xe6   :  { %v695_v45 = vpack.c.bf16 %v631_v41, %v631_v41  ;;  %v711_v46 = vpack.c.bf16 %v647_v42, %v647_v42 }
  0xe7   :  { %v664_v47 = vpack.c.bf16 %v600_v43, %v600_v43  ;;  %v680_v48 = vpack.c.bf16 %v616_v44, %v616_v44 }
  0xe8   :  { %760 = vst.msk [vmem:[%s1541_s4 + $0xac] sm:$0xf] %vm716_vm1, %v695_v45 }
  0xe9   :  { %776 = vst.msk [vmem:[%s1541_s4 + $0xec] sm:$0xf] %vm716_vm1, %v711_v46  ;;  %v466_v49 = vpop.f32.mrf.mxu2  ;;  %v506_v50 = vpop.f32.mrf.mxu3 }
  0xea   :  { %729 = vst.msk [vmem:[%s1541_s4 + $0x30] sm:$0xf] %vm716_vm1, %v664_v47  ;;  %v564_v51 = vmul.f32 %v1146_v33, %v466_v49  ;;  %v580_v52 = vmul.f32 %v1146_v33, %v506_v50  ;;  %v388_v53 = vpop.f32.mrf.mxu0  ;;  %v428_v54 = vpop.f32.mrf.mxu1 }
  0xeb   :  { %745 = vst.msk [vmem:[%s1541_s4 + $0x70] sm:$0xf] %vm716_vm1, %v680_v48  ;;  %v533_v55 = vmul.f32 %v1146_v33, %v388_v53  ;;  %v549_v56 = vmul.f32 %v1146_v33, %v428_v54 }
  0xec   :  { %v632_v57 = vadd.f32 %v1151_v34, %v564_v51  ;;  %v648_v58 = vadd.f32 %v1151_v34, %v580_v52 }
  0xed   :  { %v601_v59 = vadd.f32 %v1151_v34, %v533_v55  ;;  %v617_v60 = vadd.f32 %v1151_v34, %v549_v56 }
  0xee   :  { %v696_v61 = vpack.c.bf16 %v632_v57, %v632_v57  ;;  %v712_v62 = vpack.c.bf16 %v648_v58, %v648_v58 }
  0xef   :  { %v665_v63 = vpack.c.bf16 %v601_v59, %v601_v59  ;;  %v681_v0 = vpack.c.bf16 %v617_v60, %v617_v60 }
  0xf0   :  { %761 = vst.msk [vmem:[%s1541_s4 + $0xb0] sm:$0xf] %vm716_vm1, %v696_v61 }
  0xf1   :  { %777 = vst.msk [vmem:[%s1541_s4 + $0xf0] sm:$0xf] %vm716_vm1, %v712_v62  ;;  %v468_v1 = vpop.f32.mrf.mxu2  ;;  %v508_v2 = vpop.f32.mrf.mxu3 }
  0xf2   :  { %730 = vst.msk [vmem:[%s1541_s4 + $0x34] sm:$0xf] %vm716_vm1, %v665_v63  ;;  %v565_v3 = vmul.f32 %v1146_v33, %v468_v1  ;;  %v581_v4 = vmul.f32 %v1146_v33, %v508_v2  ;;  %v391_v5 = vpop.f32.mrf.mxu0  ;;  %v431_v6 = vpop.f32.mrf.mxu1 }
  0xf3   :  { %746 = vst.msk [vmem:[%s1541_s4 + $0x74] sm:$0xf] %vm716_vm1, %v681_v0  ;;  %v534_v7 = vmul.f32 %v1146_v33, %v391_v5  ;;  %v550_v8 = vmul.f32 %v1146_v33, %v431_v6 }
  0xf4   :  { %v633_v9 = vadd.f32 %v1151_v34, %v565_v3  ;;  %v649_v10 = vadd.f32 %v1151_v34, %v581_v4 }
  0xf5   :  { %v602_v11 = vadd.f32 %v1151_v34, %v534_v7  ;;  %v618_v12 = vadd.f32 %v1151_v34, %v550_v8 }
  0xf6   :  { %v697_v13 = vpack.c.bf16 %v633_v9, %v633_v9  ;;  %v713_v14 = vpack.c.bf16 %v649_v10, %v649_v10 }
  0xf7   :  { %v666_v15 = vpack.c.bf16 %v602_v11, %v602_v11  ;;  %v682_v16 = vpack.c.bf16 %v618_v12, %v618_v12 }
  0xf8   :  { %762 = vst.msk [vmem:[%s1541_s4 + $0xb4] sm:$0xf] %vm716_vm1, %v697_v13 }
  0xf9   :  { %778 = vst.msk [vmem:[%s1541_s4 + $0xf4] sm:$0xf] %vm716_vm1, %v713_v14  ;;  %v471_v17 = vpop.f32.mrf.mxu2  ;;  %v511_v18 = vpop.f32.mrf.mxu3 }
  0xfa   :  { %731 = vst.msk [vmem:[%s1541_s4 + $0x38] sm:$0xf] %vm716_vm1, %v666_v15  ;;  %v566_v19 = vmul.f32 %v1146_v33, %v471_v17  ;;  %v582_v20 = vmul.f32 %v1146_v33, %v511_v18  ;;  %v393_v21 = vpop.f32.mrf.mxu0  ;;  %v433_v22 = vpop.f32.mrf.mxu1 }
  0xfb   :  { %747 = vst.msk [vmem:[%s1541_s4 + $0x78] sm:$0xf] %vm716_vm1, %v682_v16  ;;  %v535_v23 = vmul.f32 %v1146_v33, %v393_v21  ;;  %v551_v24 = vmul.f32 %v1146_v33, %v433_v22 }
  0xfc   :  { %v634_v25 = vadd.f32 %v1151_v34, %v566_v19  ;;  %v650_v26 = vadd.f32 %v1151_v34, %v582_v20 }
  0xfd   :  { %v603_v27 = vadd.f32 %v1151_v34, %v535_v23  ;;  %v619_v28 = vadd.f32 %v1151_v34, %v551_v24 }
  0xfe   :  { %v698_v29 = vpack.c.bf16 %v634_v25, %v634_v25  ;;  %v714_v30 = vpack.c.bf16 %v650_v26, %v650_v26 }
  0xff   :  { %v667_v31 = vpack.c.bf16 %v603_v27, %v603_v27  ;;  %v683_v32 = vpack.c.bf16 %v619_v28, %v619_v28 }
 0x100   :  { %763 = vst.msk [vmem:[%s1541_s4 + $0xb8] sm:$0xf] %vm716_vm1, %v698_v29 }
 0x101   :  { %779 = vst.msk [vmem:[%s1541_s4 + $0xf8] sm:$0xf] %vm716_vm1, %v714_v30  ;;  %v473_v35 = vpop.f32.mrf.mxu2  ;;  %v513_v36 = vpop.f32.mrf.mxu3 }
 0x102   :  { %732 = vst.msk [vmem:[%s1541_s4 + $0x3c] sm:$0xf] %vm716_vm1, %v667_v31  ;;  %v567_v37 = vmul.f32 %v1146_v33, %v473_v35  ;;  %v583_v38 = vmul.f32 %v1146_v33, %v513_v36 }
 0x103   :  { %748 = vst.msk [vmem:[%s1541_s4 + $0x7c] sm:$0xf] %vm716_vm1, %v683_v32 }
 0x104   :  { %v635_v39 = vadd.f32 %v1151_v34, %v567_v37  ;;  %v651_v40 = vadd.f32 %v1151_v34, %v583_v38 }
 0x106   :  { %v699_v41 = vpack.c.bf16 %v635_v39, %v635_v39  ;;  %v715_v42 = vpack.c.bf16 %v651_v40, %v651_v40 }
 0x108   :  { %764 = vst.msk [vmem:[%s1541_s4 + $0xbc] sm:$0xf] %vm716_vm1, %v699_v41 }
 0x109   :  { %780 = vst.msk [vmem:[%s1541_s4 + $0xfc] sm:$0xf] %vm716_vm1, %v715_v42 }

</bundles_post_ra>
